<compile_context>
chip_gen: v5e
topology: v5e:2x2
jax: 0.10.0
libtpu: 0.0.40
codegen_flags: <defaults>
</compile_context>

<pallas_src>
import numpy as np
import jax
import jax.numpy as jnp
from jax import lax
from jax.experimental import pallas as pl
from jax.experimental.pallas import tpu as pltpu

N_QUBITS = 4
N_LAYERS = 2
PARAM_COUNT = N_LAYERS * N_QUBITS          # == param_count in DynamicQNN.__init__
DIM = 2 ** N_QUBITS                        # statevector dimension
LANE = 128                                 # TPU lane width; batch sits on lanes
MAX_TILE_CHUNKS = 32                       # 32 * 128 = 4096-lane max batch tile
MATMUL_PRECISION = jax.lax.Precision.HIGHEST

# ---------------------------------------------------------------------------
# Static circuit constants (numpy, built once).
# Convention: qubit 0 is the most-significant bit of the basis index.
# ---------------------------------------------------------------------------
def _cnot_perm(control: int, target: int) -> np.ndarray:
    P = np.zeros((DIM, DIM), dtype=np.float32)
    for k in range(DIM):
        if (k >> (N_QUBITS - 1 - control)) & 1:
            k2 = k ^ (1 << (N_QUBITS - 1 - target))
        else:
            k2 = k
        P[k2, k] = 1.0
    return P


_ENTANGLER = np.eye(DIM, dtype=np.float32)
for _j in range(N_QUBITS):
    _ENTANGLER = _cnot_perm(_j, (_j + 1) % N_QUBITS) @ _ENTANGLER

_BITS = np.zeros((N_QUBITS, DIM), dtype=np.float32)       # bit_j(k) in {0,1}
for _j in range(N_QUBITS):
    for _k in range(DIM):
        _BITS[_j, _k] = (_k >> (N_QUBITS - 1 - _j)) & 1

_ZT = np.ascontiguousarray(1.0 - 2.0 * _BITS)             # (NQ, DIM) PauliZ eigenvalues


# ---------------------------------------------------------------------------
# Trainable-layer unitary M(weights) — parameter setup glue (plain JAX, fused
# into the same jit-compiled graph as the kernel call; DIM=16 so it is tiny).
# ---------------------------------------------------------------------------
def _ry(theta):
    c = jnp.cos(theta / 2.0)
    s = jnp.sin(theta / 2.0)
    return jnp.stack([jnp.stack([c, -s]), jnp.stack([s, c])]).astype(jnp.float32)


def _layer_unitary(angles):
    U = jnp.ones((1, 1), dtype=jnp.float32)
    for j in range(N_QUBITS):
        U = jnp.kron(U, _ry(angles[j]))
    return U


def _circuit_matrix(weights):
    w = weights.reshape(N_LAYERS, N_QUBITS)
    M = jnp.eye(DIM, dtype=jnp.float32)
    ent = jnp.asarray(_ENTANGLER)
    for l in range(N_LAYERS):
        M = jnp.dot(ent,
                    jnp.dot(_layer_unitary(w[l]), M, precision=MATMUL_PRECISION),
                    precision=MATMUL_PRECISION)
    return M


# ---------------------------------------------------------------------------
# Pallas kernel: angles -> embedding amplitudes -> statevector -> probs -> <Z_j>.
# Batch is on the lane axis everywhere (lane-dense loads/stores, MXU N = batch).
# ---------------------------------------------------------------------------
def qnn_kernel(x_ref, m_ref, zt_ref, o_ref):
    # x_ref  : (NQ, tile_B)  input angles — batch on lanes
    # m_ref  : (DIM, DIM)    trainable-layer unitary M (resident)
    # zt_ref : (NQ, DIM)     PauliZ eigenvalues (+-1) per qubit row (resident)
    # o_ref  : (NQ, tile_B)  expectation values <Z_j> — batch on lanes
    tb = x_ref.shape[1]
    x = x_ref[...]
    c = jnp.cos(0.5 * x)                       # EUP slot (idle otherwise)
    s = jnp.sin(0.5 * x)

    # Basis-index bits generated in-kernel: iota + shift/AND (full-vreg VPU
    # integer work, loop-invariant per tile) — no bits operand / lane shuffles.
    k = lax.broadcasted_iota(jnp.int32, (DIM, tb), 0)

    # Angle-embedding amplitudes u[k, b] = prod_j (bit_j(k) ? sin : cos).
    # N_QUBITS is tiny & static -> unrolled; one vsel + one vmul per qubit.
    u = None
    for j in range(N_QUBITS):
        bit = (k >> (N_QUBITS - 1 - j)) & 1
        term = jnp.where(bit == 1, s[j:j + 1, :], c[j:j + 1, :])   # (DIM, tile_B)
        u = term if u is None else u * term

    # Statevector evolution through the trainable layers (MXU, N-dim = batch).
    psi = jnp.dot(m_ref[...], u,
                  precision=MATMUL_PRECISION,
                  preferred_element_type=jnp.float32)              # (DIM, tile_B)

    # Born rule + PauliZ readout; output slab is lane-dense.
    probs = psi * psi
    o_ref[...] = jnp.dot(zt_ref[...], probs,
                         precision=MATMUL_PRECISION,
                         preferred_element_type=jnp.float32)


def _batch_tiling(B):
    """Pick (tile_b, grid, padded_B).

    - tiles capped at 4096 lanes (working set stays a few hundred KB),
    - >= 2 grid steps whenever the batch spans more than one 128-lane chunk,
      so v7x's two TensorCores both get work (costs ~0.35 us on v5e/v6e),
    - padding kept below 128 columns beyond the lane-alignment minimum.
    """
    n = pl.cdiv(B, LANE)                      # 128-lane chunks needed
    if n <= 1:
        grid, chunks = 1, 1
    else:
        grid = max(2, pl.cdiv(n, MAX_TILE_CHUNKS))
        chunks = pl.cdiv(n, grid)
    tile_b = chunks * LANE
    return tile_b, grid, grid * tile_b


def _forward_impl(x, weights):
    """Equivalent of DynamicQNN.forward: stack(qnode(x[i], weights) for i in batch)."""
    x = x.astype(jnp.float32)
    B = x.shape[0]
    tile_b, grid, b_pad = _batch_tiling(B)

    # Module contract is (B, NQ); the transpose/pad are O(4*B) f32 and fuse.
    xt = x.T                                           # (NQ, B) batch on lanes
    if b_pad != B:
        # Padded samples get angle 0 (cos=1, sin=0) and are sliced off below.
        xt = jnp.pad(xt, ((0, 0), (0, b_pad - B)))

    M = _circuit_matrix(weights)                       # (DIM, DIM)

    out_t = pl.pallas_call(
        qnn_kernel,
        out_shape=jax.ShapeDtypeStruct((N_QUBITS, b_pad), jnp.float32),
        grid=(grid,),
        in_specs=[
            pl.BlockSpec((N_QUBITS, tile_b), lambda i: (0, i)),   # angles tile
            pl.BlockSpec((DIM, DIM), lambda i: (0, 0)),           # M   (resident)
            pl.BlockSpec((N_QUBITS, DIM), lambda i: (0, 0)),      # Z^T (resident)
        ],
        out_specs=pl.BlockSpec((N_QUBITS, tile_b), lambda i: (0, i)),
        compiler_params=pltpu.CompilerParams(
            dimension_semantics=("parallel",),   # batch axis: v7x 2-TC sharding
        ),
    )(xt, M, jnp.asarray(_ZT))

    return out_t[:, :B].T                              # back to (B, N_QUBITS)


dynamic_qnn_forward = jax.jit(_forward_impl)


# ---------------------------------------------------------------------------
# Pure-JAX reference.  _qnode_reference is the per-sample qnode; vmap + stack
# gives exactly the same result as DynamicQNN.forward's Python loop + stack.
# ---------------------------------------------------------------------------
def _qnode_reference(xi, weights):
    M = _circuit_matrix(weights)
    amp = jnp.ones((1,), jnp.float32)
    for j in range(N_QUBITS):
        amp = jnp.kron(
            amp, jnp.stack([jnp.cos(xi[j] / 2.0), jnp.sin(xi[j] / 2.0)])
        )
    psi = jnp.dot(M, amp, precision=MATMUL_PRECISION)
    probs = psi * psi
    return jnp.dot(jnp.asarray(_ZT), probs, precision=MATMUL_PRECISION)


reference_forward = jax.jit(jax.vmap(_qnode_reference, in_axes=(0, None)))


if __name__ == "__main__":
    key = jax.random.PRNGKey(0)
    kx, kw = jax.random.split(key)
    # Batch of 160 (not a multiple of 128): exercises padding + a 2-step
    # "parallel" batch grid while staying tiny (160 x 4 floats).
    BATCH = 160
    x = jax.random.normal(kx, (BATCH, N_QUBITS), dtype=jnp.float32)
    # nn.Parameter(torch.randn(param_count)) -> deterministic synthetic init.
    weights = jax.random.normal(kw, (PARAM_COUNT,), dtype=jnp.float32)

    out = jax.block_until_ready(dynamic_qnn_forward(x, weights))
    ref = jax.block_until_ready(reference_forward(x, weights))

    assert out.shape == (BATCH, N_QUBITS)
    np.testing.assert_allclose(np.asarray(out), np.asarray(ref), rtol=1e-4, atol=1e-5)
    print("KERNEL_OK")
</pallas_src>

<mosaic_0001>
module attributes {stable_mosaic.version = 11 : i64} {
  func.func @qnn_kernel(%arg0: i32, %arg1: memref<4x128xf32, #tpu.memory_space<vmem>>, %arg2: memref<16x16xf32, #tpu.memory_space<vmem>>, %arg3: memref<4x16xf32, #tpu.memory_space<vmem>>, %arg4: memref<4x128xf32, #tpu.memory_space<vmem>>) attributes {dimension_semantics = [#tpu.dimension_semantics<parallel>], iteration_bounds = array<i64: 2>, scalar_prefetch = 0 : i64, scratch_operands = 0 : i64, tpu.core_type = #tpu.core_type<tc>, window_params = [{transform_indices = @transform_0, window_bounds = array<i64: 4, 128>}, {pipeline_mode = #tpu.pipeline_mode<synchronous>, transform_indices = @transform_1, window_bounds = array<i64: 16, 16>}, {pipeline_mode = #tpu.pipeline_mode<synchronous>, transform_indices = @transform_2, window_bounds = array<i64: 4, 16>}, {transform_indices = @transform_3, window_bounds = array<i64: 4, 128>}]} {
    %c0 = arith.constant 0 : index
    %c0_0 = arith.constant 0 : index
    %0 = vector.load %arg1[%c0, %c0_0] : memref<4x128xf32, #tpu.memory_space<vmem>>, vector<4x128xf32>
    %cst = arith.constant 5.000000e-01 : f32
    %1 = vector.broadcast %cst : f32 to vector<4x128xf32>
    %2 = arith.mulf %1, %0 : vector<4x128xf32>
    %3 = math.cos %2 : vector<4x128xf32>
    %cst_1 = arith.constant 5.000000e-01 : f32
    %4 = vector.broadcast %cst_1 : f32 to vector<4x128xf32>
    %5 = arith.mulf %4, %0 : vector<4x128xf32>
    %6 = math.sin %5 : vector<4x128xf32>
    %7 = tpu.iota {dimensions = array<i32: 0>} : vector<16x128xi32>
    %c3_i32 = arith.constant 3 : i32
    %8 = vector.broadcast %c3_i32 : i32 to vector<16x128xi32>
    %9 = arith.shrsi %7, %8 : vector<16x128xi32>
    %c1_i32 = arith.constant 1 : i32
    %10 = vector.broadcast %c1_i32 : i32 to vector<16x128xi32>
    %11 = arith.andi %9, %10 : vector<16x128xi32>
    %c1_i32_2 = arith.constant 1 : i32
    %12 = vector.broadcast %c1_i32_2 : i32 to vector<16x128xi32>
    %13 = arith.cmpi eq, %11, %12 : vector<16x128xi32>
    %14 = vector.extract_strided_slice %6 {offsets = [0, 0], sizes = [1, 128], strides = [1, 1]} : vector<4x128xf32> to vector<1x128xf32>
    %15 = vector.extract_strided_slice %3 {offsets = [0, 0], sizes = [1, 128], strides = [1, 1]} : vector<4x128xf32> to vector<1x128xf32>
    %16 = vector.shape_cast %14 : vector<1x128xf32> to vector<1x128xf32>
    %17 = vector.broadcast %16 : vector<1x128xf32> to vector<16x128xf32>
    %18 = vector.shape_cast %15 : vector<1x128xf32> to vector<1x128xf32>
    %19 = vector.broadcast %18 : vector<1x128xf32> to vector<16x128xf32>
    %20 = arith.select %13, %17, %19 : vector<16x128xi1>, vector<16x128xf32>
    %c2_i32 = arith.constant 2 : i32
    %21 = vector.broadcast %c2_i32 : i32 to vector<16x128xi32>
    %22 = arith.shrsi %7, %21 : vector<16x128xi32>
    %c1_i32_3 = arith.constant 1 : i32
    %23 = vector.broadcast %c1_i32_3 : i32 to vector<16x128xi32>
    %24 = arith.andi %22, %23 : vector<16x128xi32>
    %c1_i32_4 = arith.constant 1 : i32
    %25 = vector.broadcast %c1_i32_4 : i32 to vector<16x128xi32>
    %26 = arith.cmpi eq, %24, %25 : vector<16x128xi32>
    %27 = vector.extract_strided_slice %6 {offsets = [1, 0], sizes = [1, 128], strides = [1, 1]} : vector<4x128xf32> to vector<1x128xf32>
    %28 = vector.extract_strided_slice %3 {offsets = [1, 0], sizes = [1, 128], strides = [1, 1]} : vector<4x128xf32> to vector<1x128xf32>
    %29 = vector.shape_cast %27 : vector<1x128xf32> to vector<1x128xf32>
    %30 = vector.broadcast %29 : vector<1x128xf32> to vector<16x128xf32>
    %31 = vector.shape_cast %28 : vector<1x128xf32> to vector<1x128xf32>
    %32 = vector.broadcast %31 : vector<1x128xf32> to vector<16x128xf32>
    %33 = arith.select %26, %30, %32 : vector<16x128xi1>, vector<16x128xf32>
    %34 = arith.mulf %20, %33 : vector<16x128xf32>
    %c1_i32_5 = arith.constant 1 : i32
    %35 = vector.broadcast %c1_i32_5 : i32 to vector<16x128xi32>
    %36 = arith.shrsi %7, %35 : vector<16x128xi32>
    %c1_i32_6 = arith.constant 1 : i32
    %37 = vector.broadcast %c1_i32_6 : i32 to vector<16x128xi32>
    %38 = arith.andi %36, %37 : vector<16x128xi32>
    %c1_i32_7 = arith.constant 1 : i32
    %39 = vector.broadcast %c1_i32_7 : i32 to vector<16x128xi32>
    %40 = arith.cmpi eq, %38, %39 : vector<16x128xi32>
    %41 = vector.extract_strided_slice %6 {offsets = [2, 0], sizes = [1, 128], strides = [1, 1]} : vector<4x128xf32> to vector<1x128xf32>
    %42 = vector.extract_strided_slice %3 {offsets = [2, 0], sizes = [1, 128], strides = [1, 1]} : vector<4x128xf32> to vector<1x128xf32>
    %43 = vector.shape_cast %41 : vector<1x128xf32> to vector<1x128xf32>
    %44 = vector.broadcast %43 : vector<1x128xf32> to vector<16x128xf32>
    %45 = vector.shape_cast %42 : vector<1x128xf32> to vector<1x128xf32>
    %46 = vector.broadcast %45 : vector<1x128xf32> to vector<16x128xf32>
    %47 = arith.select %40, %44, %46 : vector<16x128xi1>, vector<16x128xf32>
    %48 = arith.mulf %34, %47 : vector<16x128xf32>
    %c0_i32 = arith.constant 0 : i32
    %49 = vector.broadcast %c0_i32 : i32 to vector<16x128xi32>
    %50 = arith.shrsi %7, %49 : vector<16x128xi32>
    %c1_i32_8 = arith.constant 1 : i32
    %51 = vector.broadcast %c1_i32_8 : i32 to vector<16x128xi32>
    %52 = arith.andi %50, %51 : vector<16x128xi32>
    %c1_i32_9 = arith.constant 1 : i32
    %53 = vector.broadcast %c1_i32_9 : i32 to vector<16x128xi32>
    %54 = arith.cmpi eq, %52, %53 : vector<16x128xi32>
    %55 = vector.extract_strided_slice %6 {offsets = [3, 0], sizes = [1, 128], strides = [1, 1]} : vector<4x128xf32> to vector<1x128xf32>
    %56 = vector.extract_strided_slice %3 {offsets = [3, 0], sizes = [1, 128], strides = [1, 1]} : vector<4x128xf32> to vector<1x128xf32>
    %57 = vector.shape_cast %55 : vector<1x128xf32> to vector<1x128xf32>
    %58 = vector.broadcast %57 : vector<1x128xf32> to vector<16x128xf32>
    %59 = vector.shape_cast %56 : vector<1x128xf32> to vector<1x128xf32>
    %60 = vector.broadcast %59 : vector<1x128xf32> to vector<16x128xf32>
    %61 = arith.select %54, %58, %60 : vector<16x128xi1>, vector<16x128xf32>
    %62 = arith.mulf %48, %61 : vector<16x128xf32>
    %c0_10 = arith.constant 0 : index
    %c0_11 = arith.constant 0 : index
    %63 = vector.load %arg2[%c0_10, %c0_11] : memref<16x16xf32, #tpu.memory_space<vmem>>, vector<16x16xf32>
    %cst_12 = arith.constant dense<0.000000e+00> : vector<16x128xf32>
    %64 = tpu.matmul %63, %62, %cst_12 {dimension_numbers = #tpu.dot_dimension_numbers<[1], [0], [0], [1], [0, 0, 1, 1], [], []>, precision = #tpu.contract_precision<fp32>} : vector<16x16xf32>, vector<16x128xf32>, vector<16x128xf32> -> vector<16x128xf32>
    %65 = arith.mulf %64, %64 : vector<16x128xf32>
    %c0_13 = arith.constant 0 : index
    %c0_14 = arith.constant 0 : index
    %66 = vector.load %arg3[%c0_13, %c0_14] : memref<4x16xf32, #tpu.memory_space<vmem>>, vector<4x16xf32>
    %cst_15 = arith.constant dense<0.000000e+00> : vector<4x128xf32>
    %67 = tpu.matmul %66, %65, %cst_15 {dimension_numbers = #tpu.dot_dimension_numbers<[1], [0], [0], [1], [0, 0, 1, 1], [], []>, precision = #tpu.contract_precision<fp32>} : vector<4x16xf32>, vector<16x128xf32>, vector<4x128xf32> -> vector<4x128xf32>
    %c0_16 = arith.constant 0 : index
    %c0_17 = arith.constant 0 : index
    %68 = vector.load %arg4[%c0_16, %c0_17] : memref<4x128xf32, #tpu.memory_space<vmem>>, vector<4x128xf32>
    tpu.vector_store %arg4[%c0_16, %c0_17], %67 {strides = array<i32>} : memref<4x128xf32, #tpu.memory_space<vmem>>, vector<4x128xf32>,
    return
  }
  func.func @transform_0(%arg0: i32) -> (i32, i32) {
    %c0_i32 = arith.constant 0 : i32
    %c0_i32_0 = arith.constant 0 : i32
    return %c0_i32, %arg0 : i32, i32
  }
  func.func @transform_1(%arg0: i32) -> (i32, i32) {
    %c0_i32 = arith.constant 0 : i32
    %c0_i32_0 = arith.constant 0 : i32
    %c0_i32_1 = arith.constant 0 : i32
    return %c0_i32, %c0_i32_0 : i32, i32
  }
  func.func @transform_2(%arg0: i32) -> (i32, i32) {
    %c0_i32 = arith.constant 0 : i32
    %c0_i32_0 = arith.constant 0 : i32
    %c0_i32_1 = arith.constant 0 : i32
    return %c0_i32, %c0_i32_0 : i32, i32
  }
  func.func @transform_3(%arg0: i32) -> (i32, i32) {
    %c0_i32 = arith.constant 0 : i32
    %c0_i32_0 = arith.constant 0 : i32
    return %c0_i32, %arg0 : i32, i32
  }
}

</mosaic_0001>

<bundles_post_ra>
// kernel: _forward_impl.1
= control target key start
LH: loop header
LB: loop body
LE: loop exit
PB: predicated region body
PF: predicated region fallthrough
CT: control target
= control target key end

     0   :  { %s1007_s12 = smov 0   ;;  %s1129_s0 = inlined_call_operand.vmem [shape: f32[4,256], index: 0, kind: input, shape index: {}]   ;;  %s1130_s1 = inlined_call_operand.vmem [shape: f32[16,16], index: 1, kind: input, shape index: {}]   ;;  %s1131_s2 = inlined_call_operand.vmem [shape: f32[4,16], index: 2, kind: input, shape index: {}]   ;;  %s1132_s3 = inlined_call_operand.vmem [shape: f32[4,256], index: 3, kind: output, shape index: {}]  }
   0x1 LB: > { %s942_s13 = sadd.s32 4294967295, %s978_s12   ;;  %p946_p0 = scmp.ge.s32.totalorder %s978_s12, 1  ;;  %s978_s12 = sphi %s1007_s12, %s13_s12  }
   0x2   : > { %p136_p1 = scmp.lt.s32.totalorder %s978_s12, 3 }
   0x4   : > { %p137_p2 = pnand %p946_p0, %p136_p1 }
   0x5   : > { %p158_p3 = scmp.lt.s32.totalorder (!%p137_p2), %s942_s13, 1 }
   0x6   : > { %140 = sbr.rel (%p137_p2) target bundleno = 449 (0x1c1), region = 32 }
   0xb   : > { %s1138_s13 = smov (!%p158_p3, %s942_s13), 1  ;;  %v980_v13 = vmov 683565275   ;;  %v981_v15 = vmov 2475754826   ;;  %vm526_vm14 = vcmask 130048  }
   0xc   : > { %s947_s14 = sshll.u32 %s1138_s13, 2  ;;  %v982_v17 = vmov 2131351028   ;;  %v983_v19 = vmov 2102212464  }
   0xd   : > { %s161_s17 = scalar_lea.vmem %s1129_s0, %s947_s14  ;;  %v984_v21 = vmov 920167782   ;;  %v985_v27 = vmov 1326507024   ;;  %s165_s26 = scalar_lea.vmem %s1132_s3, %s947_s14 }
   0xe   : > { %v166_v0 = vld [vmem:[%s161_s17] sm:$0xf] }
   0xf   : > { %v1023_v1 = vmul.f32 0.5, %v166_v0 }
  0x11   : > { %v171_v2 = vand.u32 2139095040, %v1023_v1  ;;  %v168_v4 = vand.u32 2147483647, %v1023_v1  ;;  %vm170_vm12 = vcmp.lt.s32.totalorder %v1023_v1, 0  ;;  %vm311_vm15 = vweird.f32 %v1023_v1 }
  0x13   : > { %v172_v3 = vshrl.u32 %v171_v2, 23  ;;  %v175_v7 = vand.u32 8388607, %v168_v4  ;;  %v986_v2 = vmov 0   ;;  %vm169_vm13 = vcmp.le.f32.partialorder %v168_v4, 0.7853982 }
  0x14   : > { %v524_v4 = vld [vmem:[%s1130_s1] sm:$0xff] }
  0x15   : > { %v949_v5 = vadd.s32 4294967169, %v172_v3  ;;  %v176_v10 = vor.u32 8388608, %v175_v7 }
  0x17   : > { %v178_v6 = vadd.s32 1, %v949_v5  ;;  %v1032_v29 = vshll.u32 %v176_v10, 8 }
  0x19   : > { %vm179_vm0 = vcmp.gt.s32.totalorder %v178_v6, 0  ;;  %v217_v41 = vand.u32 65535, %v1032_v29  ;;  %v218_v42 = vshrl.u32 %v1032_v29, 16 }
  0x1a   : > { %v180_v8 = vsel %vm179_vm0, %v178_v6, 0 }
  0x1b   : > { %v182_v9 = vand.u32 31, %v180_v8  ;;  %v1029_v11 = vshrl.u32 %v180_v8, 5 }
  0x1d   : > { %v183_v12 = vsub.s32 32, %v182_v9  ;;  %v185_v14 = vshll.u32 %v980_v13, %v182_v9  ;;  %v188_v16 = vshll.u32 %v981_v15, %v182_v9  ;;  %v191_v18 = vshll.u32 %v982_v17, %v182_v9 }
  0x1e   : > { %v194_v20 = vshll.u32 %v983_v19, %v182_v9  ;;  %v197_v22 = vshll.u32 %v984_v21, %v182_v9  ;;  %vm200_vm1 = vcmp.lt.s32.totalorder %v1029_v11, 1  ;;  %vm203_vm2 = vcmp.lt.s32.totalorder %v1029_v11, 4 }
  0x1f   : > { %v186_v23 = vshrl.u32 %v981_v15, %v183_v12  ;;  %v189_v24 = vshrl.u32 %v982_v17, %v183_v12  ;;  %v192_v25 = vshrl.u32 %v983_v19, %v183_v12  ;;  %v195_v26 = vshrl.u32 %v984_v21, %v183_v12 }
  0x20   : > { %v198_v28 = vshrl.u32 %v985_v27, %v183_v12  ;;  %vm202_vm3 = vcmp.lt.s32.totalorder %v1029_v11, 3  ;;  %vm201_vm4 = vcmp.lt.s32.totalorder %v1029_v11, 2  ;;  %v184_v49 = vshrl.u32 %v980_v13, %v183_v12 }
  0x21   : > { %v187_v30 = vor.u32 %v186_v23, %v185_v14  ;;  %v190_v31 = vor.u32 %v189_v24, %v188_v16  ;;  %v193_v32 = vor.u32 %v192_v25, %v191_v18  ;;  %v196_v33 = vor.u32 %v195_v26, %v194_v20 }
  0x22   : > { %v199_v34 = vor.u32 %v198_v28, %v197_v22 }
  0x23   : > { %v208_v35 = vsel %vm200_vm1, %v187_v30, %v190_v31  ;;  %v212_v36 = vsel %vm200_vm1, %v190_v31, %v193_v32  ;;  %v209_v37 = vsel %vm203_vm2, %v196_v33, 920167782  ;;  %v204_v62 = vsel %vm200_vm1, %v184_v49, %v187_v30 }
  0x24   : > { %v213_v38 = vsel %vm203_vm2, %v199_v34, 1326507024  ;;  %v210_v39 = vsel %vm202_vm3, %v193_v32, %v209_v37  ;;  %v205_v0 = vsel %vm203_vm2, %v193_v32, 2102212464 }
  0x25   : > { %v214_v40 = vsel %vm202_vm3, %v196_v33, %v213_v38  ;;  %v211_v43 = vsel %vm201_vm4, %v208_v35, %v210_v39  ;;  %v206_v13 = vsel %vm202_vm3, %v190_v31, %v205_v0 }
  0x26   : > { %v215_v44 = vsel %vm201_vm4, %v212_v36, %v214_v40  ;;  %v241_v47 = vand.u32 65535, %v211_v43  ;;  %v242_v48 = vshrl.u32 %v211_v43, 16  ;;  %v207_v21 = vsel %vm201_vm4, %v204_v62, %v206_v13 }
  0x27   : > { %v219_v45 = vand.u32 65535, %v215_v44  ;;  %v220_v46 = vshrl.u32 %v215_v44, 16  ;;  %v261_v25 = vmul.u32 %v1032_v29, %v207_v21  ;;  %v528_v13 = vsel %vm526_vm14, %v524_v4, 0 }
  0x28   : > { %v243_v53 = vmul.u32 %v241_v47, %v217_v41  ;;  %v244_v54 = vmul.u32 %v242_v48, %v217_v41  ;;  %v245_v55 = vmul.u32 %v241_v47, %v218_v42  ;;  %v246_v59 = vmul.u32 %v242_v48, %v218_v42 }
  0x29   : > { %v221_v50 = vmul.u32 %v219_v45, %v217_v41  ;;  %v222_v51 = vmul.u32 %v220_v46, %v217_v41  ;;  %v223_v52 = vmul.u32 %v219_v45, %v218_v42  ;;  %v224_v56 = vmul.u32 %v220_v46, %v218_v42 }
  0x2a   : > { %v247_v60 = vshll.u32 %v244_v54, 16  ;;  %v249_v61 = vshll.u32 %v245_v55, 16  ;;  %v248_v10 = vshrl.u32 %v244_v54, 16  ;;  %v250_v17 = vshrl.u32 %v245_v55, 16 }
  0x2b   : > { %v225_v57 = vshll.u32 %v222_v51, 16  ;;  %v227_v58 = vshll.u32 %v223_v52, 16  ;;  %v226_v6 = vshrl.u32 %v222_v51, 16  ;;  %v228_v14 = vshrl.u32 %v223_v52, 16 }
  0x2c   : > { %vm251_vm6 = vc.u32 %v243_v53, %v247_v60  ;;  %v253_v5 = vadd.s32 %v247_v60, %v243_v53  ;;  %v1079_v21 = vand.u32 4294901760, %v528_v13 }
  0x2d   : > { %vm229_vm5 = vc.u32 %v221_v50, %v225_v57  ;;  %v231_v63 = vadd.s32 %v225_v57, %v221_v50  ;;  %v252_v8 = vsel %vm251_vm6, 1, %v986_v2  ;;  %v477_v50 = vlaneseq }
  0x2e   : > { %v230_v3 = vsel %vm229_vm5, 1, %v986_v2  ;;  %v254_v12 = vadd.s32 %v252_v8, %v246_v59  ;;  %vm255_vm8 = vc.u32 %v253_v5, %v249_v61  ;;  %v257_v20 = vadd.s32 %v253_v5, %v249_v61 }
  0x2f   : > { %v232_v7 = vadd.s32 %v230_v3, %v224_v56  ;;  %vm233_vm7 = vc.u32 %v231_v63, %v227_v58  ;;  %v256_v16 = vsel %vm255_vm8, 1, %v986_v2  ;;  %v1068_v55 = vshrl.u32 %v477_v50, 7 }
  0x30   : > { %v234_v9 = vsel %vm233_vm7, 1, %v986_v2  ;;  %v258_v18 = vadd.s32 %v256_v16, %v254_v12 }
  0x31   : > { %v236_v15 = vadd.s32 %v234_v9, %v232_v7  ;;  %v479_v60 = vadd.s32 8, %v1068_v55  ;;  %v480_v12 = vshra.s32 %v1068_v55, 3  ;;  %v490_v16 = vshra.s32 %v1068_v55, 2 }
  0x32   : > { %v259_v22 = vadd.s32 %v258_v18, %v248_v10  ;;  %v502_v18 = vshra.s32 %v1068_v55, 1 }
  0x33   : > { %v237_v19 = vadd.s32 %v236_v15, %v226_v6  ;;  %v481_v5 = vshra.s32 %v479_v60, 3  ;;  %v491_v9 = vshra.s32 %v479_v60, 2  ;;  %v503_v10 = vshra.s32 %v479_v60, 1 }
  0x34   : > { %v260_v24 = vadd.s32 %v259_v22, %v250_v17 }
  0x35   : > { %v238_v23 = vadd.s32 %v237_v19, %v228_v14  ;;  %v483_v17 = vand.u32 1, %v481_v5  ;;  %v493_v22 = vand.u32 1, %v491_v9 }
  0x36   : > { %v264_v26 = vadd.s32 1, %v260_v24 }
  0x37   : > { %vm263_vm9 = vc.u32 %v238_v23, %v257_v20  ;;  %v262_v11 = vadd.s32 %v257_v20, %v238_v23  ;;  %v505_v23 = vand.u32 1, %v503_v10  ;;  %vm485_vm6 = vcmp.eq.s32.totalorder %v483_v17, 1 }
  0x38   : > { %v265_v27 = vsel %vm263_vm9, %v264_v26, %v260_v24  ;;  %v482_v24 = vand.u32 1, %v480_v12  ;;  %vm495_vm7 = vcmp.eq.s32.totalorder %v493_v22, 1 }
  0x39   : > { %v266_v28 = vadd.s32 %v265_v27, %v261_v25  ;;  %v515_v27 = vand.u32 1, %v479_v60  ;;  %vm507_vm8 = vcmp.eq.s32.totalorder %v505_v23, 1 }
  0x3a   : > { %vm484_vm9 = vcmp.eq.s32.totalorder %v482_v24, 1 }
  0x3b   : > { %v267_v30 = vadd.s32 536870912, %v266_v28 }
  0x3d   : > { %v268_v31 = vshrl.u32 %v267_v30, 30  ;;  %v525_v30 = vld [vmem:[%s1130_s1 + $0x8] sm:$0xff] }
  0x3f   : > { %v269_v32 = vshll.u32 %v268_v31, 30  ;;  %v292_v49 = vsub.s32 4, %v268_v31 }
  0x41   : > { %v270_v33 = vsub.s32 %v266_v28, %v269_v32  ;;  %v293_v53 = vsel %vm170_vm12, %v292_v49, %v268_v31  ;;  %v492_v28 = vand.u32 1, %v490_v16  ;;  %v504_v31 = vand.u32 1, %v502_v18 }
  0x42   : > { %v295_v57 = vsel %vm169_vm13, 0, %v293_v53  ;;  %v514_v32 = vand.u32 1, %v1068_v55 }
  0x43   : > { %vm271_vm10 = vcmp.lt.s32.totalorder %v270_v33, 0  ;;  %v272_v34 = vsub.s32 0, %v270_v33  ;;  %v466_v63 = vadd.s32 3, %v295_v57  ;;  %v312_v3 = vand.u32 3, %v295_v57 }
  0x45   : > { %v273_v35 = vsel %vm271_vm10, %v272_v34, %v270_v33  ;;  %v467_v8 = vand.u32 3, %v466_v63  ;;  %vm313_vm0 = vcmp.lt.s32.totalorder %v312_v3, 2  ;;  %vm314_vm1 = vcmp.eq.s32.totalorder %v312_v3, 0 }
  0x46   : > { %v274_v36 = vclz %v273_v35  ;;  %vm317_vm2 = vcmp.eq.s32.totalorder %v312_v3, 2  ;;  %vm1090_vm10 = vcmp.eq.s32.totalorder %v515_v27, 1 }
  0x47   : > { %vm469_vm3 = vcmp.eq.s32.totalorder %v467_v8, 0  ;;  %vm472_vm4 = vcmp.eq.s32.totalorder %v467_v8, 2  ;;  %vm468_vm5 = vcmp.lt.s32.totalorder %v467_v8, 2 }
  0x48   : > { %v950_v37 = vadd.s32 4294967294, %v274_v36  ;;  %v552_v36 = vsub.f32 %v528_v13, %v1079_v21 }
  0x4a   : > { %vm951_vm11 = vcmp.lt.s32.totalorder %v950_v37, 0 }
  0x4b   : > { %v277_v38 = vsel %vm951_vm11, 0, %v950_v37  ;;  %v531_v37 = vsel %vm526_vm14, %v525_v30, 0  ;;  %vm494_vm11 = vcmp.eq.s32.totalorder %v492_v28, 1 }
  0x4c   : > { %v278_v39 = vsub.s32 32, %v277_v38  ;;  %v279_v40 = vshll.u32 %v270_v33, %v277_v38  ;;  %v282_v41 = vsub.s32 4294967266, %v277_v38 }
  0x4e   : > { %v280_v29 = vshrl.u32 %v262_v11, %v278_v39  ;;  %v283_v42 = vadd.s32 127, %v282_v41 }
  0x50   : > { %v281_v43 = vor.u32 %v280_v29, %v279_v40  ;;  %v284_v44 = vshll.u32 %v283_v42, 23 }
  0x52   : > { %v285_v45 = vor.u32 4788187, %v284_v44  ;;  %v288_v46 = vcvt.s32.f32 %v281_v43  ;;  %v553_v44 = vand.u32 4294901760, %v552_v36 }
  0x54   : > { %v286_v47 = vand.u32 2147483647, %v285_v45  ;;  %v559_v45 = vand.u32 4294901760, %v531_v37 }
  0x56   : > { %v289_v48 = vmul.f32 %v288_v46, %v286_v47  ;;  %v560_v3 = vsub.f32 %v531_v37, %v559_v45 }
  0x58   : > { %v290_v51 = vxor.u32 2147483648, %v289_v48  ;;  %v561_v9 = vand.u32 4294901760, %v560_v3 }
  0x5a   : > { %v291_v52 = vsel %vm170_vm12, %v290_v51, %v289_v48  ;;  %vm506_vm12 = vcmp.eq.s32.totalorder %v504_v31, 1  ;;  %v725_v31 = vld [vmem:[%s1131_s2] sm:$0xf] }
  0x5b   : > { %v294_v54 = vsel %vm169_vm13, %v1023_v1, %v291_v52  ;;  %vm1096_vm13 = vcmp.eq.s32.totalorder %v514_v32, 1 }
  0x5c   : > { %v296_v56 = vmul.f32 %v294_v54, %v294_v54 }
  0x5e   : > { %v297_v58 = vmul.f32 -0.001358992, %v296_v56  ;;  %v304_v59 = vmul.f32 -0.00019511016, %v296_v56 }
  0x60   : > { %v298_v61 = vadd.f32 0.041655596, %v297_v58  ;;  %v305_v62 = vadd.f32 0.008332121, %v304_v59 }
  0x62   : > { %v299_v0 = vmul.f32 %v298_v61, %v296_v56  ;;  %v306_v2 = vmul.f32 %v305_v62, %v296_v56 }
  0x64   : > { %v300_v6 = vadd.f32 -0.4999988, %v299_v0  ;;  %v307_v7 = vadd.f32 -0.16666654, %v306_v2  ;;  %v554_v2 = vsub.f32 %v552_v36, %v553_v44 }
  0x66   : > { %v301_v14 = vmul.f32 %v300_v6, %v296_v56  ;;  %v308_v15 = vmul.f32 %v307_v7, %v296_v56  ;;  %v555_v8 = vand.u32 4294901760, %v554_v2 }
  0x68   : > { %v302_v19 = vadd.f32 1.0, %v301_v14  ;;  %v309_v20 = vadd.f32 1.0, %v308_v15  ;;  %v562_v15 = vsub.f32 %v560_v3, %v561_v9 }
  0x6a   : > { %v310_v25 = vmul.f32 %v309_v20, %v294_v54  ;;  %v318_v26 = vxor.u32 2147483648, %v302_v19  ;;  %v563_v20 = vand.u32 4294901760, %v562_v15 }
  0x6c   : > { %v315_v33 = vxor.u32 2147483648, %v310_v25  ;;  %v319_v34 = vsel %vm317_vm2, %v318_v26, %v310_v25  ;;  %v474_v35 = vsel %vm472_vm4, %v318_v26, %v310_v25 }
  0x6e   : > { %v316_v11 = vsel %vm314_vm1, %v302_v19, %v315_v33  ;;  %v471_v38 = vsel %vm469_vm3, %v302_v19, %v315_v33  ;;  %v727_v33 = vsel %vm526_vm14, %v725_v31, 0 }
  0x6f   : > { %v320_v40 = vsel %vm313_vm0, %v316_v11, %v319_v34  ;;  %v475_v41 = vsel %vm468_vm5, %v471_v38, %v474_v35  ;;  %v747_v37 = vand.u32 4294901760, %v727_v33 }
  0x70   : > { %v321_v42 = vsel %vm311_vm15, nan, %v320_v40  ;;  %v476_v43 = vsel %vm311_vm15, nan, %v475_v41 }
  0x71   : > { %v486_v46 = vperm.slane %v476_v43, 0  ;;  %v487_v47 = vperm.slane %v321_v42, 0  ;;  %v496_v48 = vperm.slane %v476_v43, 1  ;;  %v497_v49 = vperm.slane %v321_v42, 1 }
  0x72   : > { %v508_v50 = vperm.slane %v476_v43, 2  ;;  %v509_v51 = vperm.slane %v321_v42, 2  ;;  %v518_v52 = vperm.slane %v476_v43, 3  ;;  %v519_v53 = vperm.slane %v321_v42, 3 }
  0x73   : > { %v489_v54 = vsel %vm485_vm6, %v486_v46, %v487_v47  ;;  %v499_v55 = vsel %vm495_vm7, %v496_v48, %v497_v49  ;;  %v488_v56 = vsel %vm484_vm9, %v486_v46, %v487_v47  ;;  %v498_v57 = vsel %vm494_vm11, %v496_v48, %v497_v49 }
  0x74   : > { %v501_v1 = vmul.f32 %v499_v55, %v489_v54  ;;  %v511_v58 = vsel %vm507_vm8, %v508_v50, %v509_v51  ;;  %v500_v59 = vmul.f32 %v498_v57, %v488_v56  ;;  %v521_v60 = vsel %vm1090_vm10, %v518_v52, %v519_v53 }
  0x75   : > { %v510_v61 = vsel %vm506_vm12, %v508_v50, %v509_v51  ;;  %v520_v62 = vsel %vm1096_vm13, %v518_v52, %v519_v53  ;;  %v748_v29 = vsub.f32 %v727_v33, %v747_v37 }
  0x76   : > { %v513_v63 = vmul.f32 %v511_v58, %v501_v1  ;;  %v512_v0 = vmul.f32 %v510_v61, %v500_v59 }
  0x77   : > { %v749_v46 = vand.u32 4294901760, %v748_v29 }
  0x78   : > { %v523_v4 = vmul.f32 %v521_v60, %v513_v63  ;;  %v522_v5 = vmul.f32 %v520_v62, %v512_v0 }
  0x79   : > { %v750_v51 = vsub.f32 %v748_v29, %v749_v46 }
  0x7a   : > { %v547_v6 = vand.u32 4294901760, %v523_v4  ;;  %v549_v7 = vand.u32 4294901760, %v522_v5 }
  0x7b   : > { %v751_v55 = vand.u32 4294901760, %v750_v51 }
  0x7c   : > { %548 = vmatpush.msra.mxu0 %v547_v6  ;;  %v583_v10 = vsub.f32 %v523_v4, %v547_v6  ;;  %v589_v12 = vsub.f32 %v522_v5, %v549_v7  ;;  %649 = vmatpush.msra.mxu3 %v547_v6 }
  0x7e   : > { %550 = vmatpush.msra.mxu0 %v549_v7  ;;  %619 = vmatpush.msra.mxu2 %v583_v10  ;;  %v584_v13 = vand.u32 4294901760, %v583_v10  ;;  %v590_v14 = vand.u32 4294901760, %v589_v12 }
  0x7f   : > { %556 = vmatmul.f32.vlgmr.msra.gmra.mxu0 %v555_v8  ;;  %651 = vmatpush.msra.mxu3 %v549_v7 }
  0x80   : > { %622 = vmatpush.msra.mxu2 %v589_v12  ;;  %v585_v16 = vsub.f32 %v583_v10, %v584_v13  ;;  %655 = vmatmul.f32.vlgmr.msra.gmra.mxu3 %v553_v44  ;;  %v591_v17 = vsub.f32 %v589_v12, %v590_v14 }
  0x81   : > { %625 = vmatmul.f32.vlgmr.msra.gmra.mxu2 %v552_v36  ;;  %682 = vmatpush.msrb.mxu0 %v584_v13 }
  0x82   : > { %v586_v18 = vand.u32 4294901760, %v585_v16  ;;  %v592_v19 = vand.u32 4294901760, %v591_v17 }
  0x83   : > { %686 = vmatpush.msrb.mxu0 %v590_v14 }
  0x84   : > { %587 = vmatpush.msra.mxu1 %v586_v18 }
  0x86   : > { %593 = vmatpush.msra.mxu1 %v592_v19 }
  0x87   : > { %564 = vmatmul.f32.gmra.mxu0 %v563_v20  ;;  %595 = vmatmul.f32.vlgmr.msra.gmra.mxu1 %v1079_v21 }
  0x88   : > { %661 = vmatmul.f32.gmra.mxu3 %v561_v9  ;;  %711 = vmatpush.msrb.mxu1 %v547_v6 }
  0x89   : > { %630 = vmatmul.f32.gmra.mxu2 %v560_v3 }
  0x8a   : > { %713 = vmatpush.msrb.mxu1 %v549_v7 }
  0x8f   : > { %599 = vmatmul.f32.gmra.mxu1 %v559_v45  ;;  %688 = vmatmul.f32.vlgmr.msrb.gmra.mxu0 %v1079_v21 }
  0x97   : > { %692 = vmatmul.f32.gmra.mxu0 %v559_v45  ;;  %715 = vmatmul.f32.vlgmr.msrb.gmra.mxu1 %v1079_v21 }
  0x9f   : > { %719 = vmatmul.f32.gmra.mxu1 %v559_v45 }
  0xfc   : > { %v557_v22 = vpop.f32.mrf.mxu0 }
 0x103   : > { %v656_v27 = vpop.f32.mrf.mxu3 }
 0x104   : > { %v565_v23 = vpop.f32.mrf.mxu0  ;;  %v596_v24 = vpop.f32.mrf.mxu1 }
 0x105   : > { %v626_v25 = vpop.f32.mrf.mxu2  ;;  %v597_v26 = vadd.f32 %v596_v24, %v557_v22 }
 0x107   : > { %v627_v30 = vadd.f32 %v626_v25, %v597_v26 }
 0x109   : > { %v657_v34 = vadd.f32 %v656_v27, %v627_v30 }
 0x10b   : > { %v662_v40 = vpop.f32.mrf.mxu3 }
 0x10c   : > { %v600_v28 = vpop.f32.mrf.mxu1  ;;  %v689_v32 = vpop.f32.mrf.mxu0 }
 0x10d   : > { %v601_v35 = vadd.f32 %v600_v28, %v565_v23  ;;  %v631_v36 = vpop.f32.mrf.mxu2  ;;  %v690_v21 = vadd.f32 %v689_v32, %v657_v34 }
 0x10f   : > { %v632_v38 = vadd.f32 %v631_v36, %v601_v35 }
 0x111   : > { %v663_v43 = vadd.f32 %v662_v40, %v632_v38 }
 0x114   : > { %v716_v11 = vpop.f32.mrf.mxu1  ;;  %v693_v42 = vpop.f32.mrf.mxu0 }
 0x115   : > { %v717_v39 = vadd.f32 %v716_v11, %v690_v21  ;;  %v694_v44 = vadd.f32 %v693_v42, %v663_v43 }
 0x117   : > { %v723_v41 = vmul.f32 %v717_v39, %v717_v39 }
 0x119   : > { %v745_v45 = vand.u32 4294901760, %v723_v41 }
 0x11b   : > { %v777_v49 = vsub.f32 %v723_v41, %v745_v45 }
 0x11c   : > { %v720_v47 = vpop.f32.mrf.mxu1 }
 0x11d   : > { %v721_v48 = vadd.f32 %v720_v47, %v694_v44  ;;  %v778_v54 = vand.u32 4294901760, %v777_v49 }
 0x11f   : > { %v724_v50 = vmul.f32 %v721_v48, %v721_v48  ;;  %v779_v1 = vsub.f32 %v777_v49, %v778_v54 }
 0x121   : > { %v743_v52 = vand.u32 4294901760, %v724_v50  ;;  %v780_v59 = vand.u32 4294901760, %v779_v1 }
 0x123   : > { %v771_v53 = vsub.f32 %v724_v50, %v743_v52  ;;  %744 = vmatpush.msrb.mxu2 %v743_v52  ;;  %880 = vmatpush.msra.mxu1 %v743_v52 }
 0x125   : > { %746 = vmatpush.msrb.mxu2 %v745_v45  ;;  %882 = vmatpush.msra.mxu1 %v745_v45  ;;  %v772_v56 = vand.u32 4294901760, %v771_v53 }
 0x126   : > { %884 = vmatmul.f32.vlgmr.msra.gmra.mxu1 %v747_v37  ;;  %752 = vmatmul.f32.vlgmr.msrb.gmra.mxu2 %v751_v55 }
 0x127   : > { %803 = vmatpush.msra.mxu2 %v771_v53  ;;  %855 = vmatpush.msra.mxu0 %v772_v56  ;;  %v773_v57 = vsub.f32 %v771_v53, %v772_v56 }
 0x129   : > { %806 = vmatpush.msra.mxu2 %v777_v49  ;;  %859 = vmatpush.msra.mxu0 %v778_v54  ;;  %v774_v58 = vand.u32 4294901760, %v773_v57 }
 0x12a   : > { %861 = vmatmul.f32.vlgmr.msra.gmra.mxu0 %v747_v37 }
 0x12b   : > { %775 = vmatpush.msrb.mxu3 %v774_v58 }
 0x12d   : > { %781 = vmatpush.msrb.mxu3 %v780_v59 }
 0x12e   : > { %783 = vmatmul.f32.vlgmr.msrb.gmra.mxu3 %v747_v37  ;;  %809 = vmatmul.f32.vlgmr.msra.gmra.mxu2 %v748_v29 }
 0x12f   : > { %828 = vmatpush.msra.mxu3 %v743_v52 }
 0x131   : > { %830 = vmatpush.msra.mxu3 %v745_v45 }
 0x136   : > { %834 = vmatmul.f32.vlgmr.msra.gmra.mxu3 %v749_v46 }
 0x1a3   : > { %v885_v5 = vpop.f32.mrf.mxu1 }
 0x1a7   : > { %v862_v3 = vpop.f32.mrf.mxu0 }
 0x1a9   : > { %v753_v60 = vpop.f32.mrf.mxu2 }
 0x1b1   : > { %v784_v61 = vpop.f32.mrf.mxu3  ;;  %v810_v63 = vpop.f32.mrf.mxu2 }
 0x1b2   : > { %v785_v62 = vadd.f32 %v784_v61, %v753_v60 }
 0x1b4   : > { %v811_v0 = vadd.f32 %v810_v63, %v785_v62 }
 0x1b9   : > { %v835_v2 = vpop.f32.mrf.mxu3 }
 0x1ba   : > { %v836_v4 = vadd.f32 %v835_v2, %v811_v0 }
 0x1bc   : > { %v863_v6 = vadd.f32 %v862_v3, %v836_v4 }
 0x1be   : > { %v886_v7 = vadd.f32 %v885_v5, %v863_v6 }
 0x1c0   : > { %888 = vst [vmem:[%s165_s26] sm:$0xf] %v886_v7 }
 0x1c1 PF: > { %s13_s12 = sadd.s32 1, %s978_s12  }
 0x1c2   : > { %p10_p4 = scmp.ge.s32.totalorder %s13_s12, 4  }
 0x1c4   :  { %12 = sbr.rel (!%p10_p4) target bundleno = 1 (0x1), region = 62 }

</bundles_post_ra>
